<compile_context>
chip_gen: v7x
topology: tpu7x:2x2x1
jax: 0.10.0
libtpu: 0.0.40
codegen_flags: <defaults>
</compile_context>

<pallas_src>
import jax
import jax.numpy as jnp
import numpy as np
from jax.experimental import pallas as pl
from jax.experimental.pallas import tpu as pltpu


def _round_up(x, m):
    return (x + m - 1) // m * m


# ---------------------------------------------------------------------------
# Upsample (linear, scale 2, align_corners=True) + F.pad as a (L1, L2) matrix
# ---------------------------------------------------------------------------
def _interp_pad_matrix(L1, L2):
    L_up = 2 * L1
    diff = L2 - L_up
    assert diff >= 0, "this synthetic example assumes non-negative padding"
    pad_l = diff // 2
    if L_up == 1:
        pos = jnp.zeros((1,), jnp.float32)
    else:
        pos = jnp.arange(L_up, dtype=jnp.float32) * (L1 - 1) / (L_up - 1)
    lo = jnp.clip(jnp.floor(pos).astype(jnp.int32), 0, L1 - 1)
    hi = jnp.minimum(lo + 1, L1 - 1)
    w = pos - lo.astype(jnp.float32)
    u_up = (jax.nn.one_hot(lo, L1, dtype=jnp.float32).T * (1.0 - w)
            + jax.nn.one_hot(hi, L1, dtype=jnp.float32).T * w)     # (L1, L_up)
    u = jnp.zeros((L1, L2), jnp.float32)
    u = u.at[:, pad_l:pad_l + L_up].set(u_up)
    return u


# ---------------------------------------------------------------------------
# Pallas wrapper (all parameter folding / layout prep happens here)
# ---------------------------------------------------------------------------
def up_forward(x1, x2, params):
    N, C1, L1 = x1.shape
    N2, C2, L2 = x2.shape
    assert N == N2
    C_out = params["w1"].shape[1]

    SUB, LANE = 16, 128                 # bf16 sublane packing, lane width
    C1p = _round_up(C1, SUB)
    C2p = _round_up(C2, SUB)
    Cop = _round_up(C_out, SUB)
    L1p = _round_up(L1, LANE)
    L2p = _round_up(L2, LANE)

    # ---- fold BatchNorm scale into weights, conv bias into BN shift --------
    s1, s2 = params["s1"], params["s2"]
    w1f = params["w1"] * s1[None]             # (3, Cout, Cin) scaled per out-ch
    w2f = params["w2"] * s2[None]
    t1f = params["t1"] + s1 * params["b1"]    # (Cout, 1) combined shift
    t2f = params["t2"] + s2 * params["b2"]

    def merge_pad(w, cinp, coutp):
        # (3, Cout, Cin) -> (coutp, 3*cinp), column order matching the
        # tap-stacked input [x_{l-1}; x_l; x_{l+1}].
        _, co, ci = w.shape
        w = jnp.pad(w, ((0, 0), (0, coutp - co), (0, cinp - ci)))
        return jnp.transpose(w, (1, 0, 2)).reshape(coutp, 3 * cinp)

    # Fused conv1 weight: [x2-half | upsampled-x1-half]  -> one MXU matmul.
    w1m = jnp.concatenate([merge_pad(w1f[:, :, :C2], C2p, Cop),
                           merge_pad(w1f[:, :, C2:], C1p, Cop)],
                          axis=1).astype(jnp.bfloat16)   # (Cop, 3*(C2p+C1p))
    w2m = merge_pad(w2f, Cop, Cop).astype(jnp.bfloat16)  # (Cop, 3*Cop)

    # Per-channel shifts, pre-broadcast along lanes (f32).  The conv1 shift
    # gets -1e30 on padded lanes so the ReLU zeroes them (this replaces an
    # explicit valid-lane mask and prevents the rolled taps of conv2 from
    # picking up garbage from the lane padding).
    lane_valid = jnp.arange(L2p) < L2
    t1b = jnp.where(lane_valid[None, :],
                    jnp.broadcast_to(jnp.pad(t1f, ((0, Cop - C_out), (0, 0))),
                                     (Cop, L2p)),
                    -1e30).astype(jnp.float32)
    t2b = jnp.broadcast_to(jnp.pad(t2f, ((0, Cop - C_out), (0, 0))),
                           (Cop, L2p)).astype(jnp.float32)

    # ---- activations: zero-pad channels to 16, lanes to 128 multiples ------
    x1t = jnp.pad(x1, ((0, 0), (0, C1p - C1), (0, L1p - L1)))   # (N, C1p, L1p)
    x2t = jnp.pad(x2, ((0, 0), (0, C2p - C2), (0, L2p - L2)))   # (N, C2p, L2p)

    # Per-sample upsample+pad matrix (no O(N^2) block-diagonal kron).
    u = jnp.pad(_interp_pad_matrix(L1, L2),
                ((0, L1p - L1), (0, L2p - L2))).astype(jnp.bfloat16)

    # -----------------------------------------------------------------------
    # Kernel: one sample per grid step; lane axis = L2p (128-multiple).
    # -----------------------------------------------------------------------
    def kernel(x1_ref, x2_ref, u_ref, w1_ref, t1_ref, w2_ref, t2_ref, o_ref):
        def taps(x):
            # [x_{l-1}; x_l; x_{l+1}] stacked along channels.  pltpu.roll wraps
            # into the zero lane padding, so the conv's zero padding at the
            # sequence boundaries comes for free (XLU slot, co-issues w/ MXU).
            prev = pltpu.roll(x, 1, axis=1)          # x[l-1]
            nxt = pltpu.roll(x, L2p - 1, axis=1)     # x[l+1]
            return jnp.concatenate([prev, x, nxt], axis=0)

        # Upsample + F.pad of x1: one MXU matmul against the (L1p, L2p) matrix.
        x1_up = jnp.dot(x1_ref[...].astype(jnp.bfloat16), u_ref[...],
                        preferred_element_type=jnp.float32)     # (C1p, L2p) f32

        # Conv1 + BN + ReLU: channel concat eliminated, single fused matmul.
        stacked = jnp.concatenate([taps(x2_ref[...]), taps(x1_up)], axis=0)
        y1 = (jnp.dot(w1_ref[...], stacked.astype(jnp.bfloat16),
                      preferred_element_type=jnp.float32) + t1_ref[...])
        h = jnp.maximum(y1, 0.0)        # padded lanes forced to 0 by -1e30 bias

        # Conv2 + BN + ReLU.
        y2 = (jnp.dot(w2_ref[...], taps(h).astype(jnp.bfloat16),
                      preferred_element_type=jnp.float32) + t2_ref[...])
        o_ref[...] = jnp.maximum(y2, 0.0).astype(o_ref.dtype)

    def sample_spec(cp, lp):
        return pl.BlockSpec((None, cp, lp), lambda n: (n, 0, 0))

    def const_spec(arr):
        nd = arr.ndim
        return pl.BlockSpec(arr.shape, lambda n: (0,) * nd)

    out = pl.pallas_call(
        kernel,
        out_shape=jax.ShapeDtypeStruct((N, Cop, L2p), jnp.float32),
        grid=(N,),
        in_specs=[sample_spec(C1p, L1p), sample_spec(C2p, L2p),
                  const_spec(u), const_spec(w1m), const_spec(t1b),
                  const_spec(w2m), const_spec(t2b)],
        out_specs=pl.BlockSpec((None, Cop, L2p), lambda n: (n, 0, 0)),
        compiler_params=pltpu.CompilerParams(
            dimension_semantics=("parallel",)),
    )(x1t, x2t, u, w1m, t1b, w2m, t2b)

    # (N, Cop, L2p) -> (N, C_out, L2): strip channel / lane padding.
    return out[:, :C_out, :L2]


# ---------------------------------------------------------------------------
# Pure-JAX reference (same math, f32 everywhere, no Pallas) for a sanity check
# ---------------------------------------------------------------------------
def up_reference(x1, x2, params):
    U = _interp_pad_matrix(x1.shape[2], x2.shape[2])
    x1u = jnp.einsum('ncl,lm->ncm', x1, U)
    x = jnp.concatenate([x2, x1u], axis=1)

    def cbr(x, w, b, s, t):
        zero = jnp.zeros(x.shape[:2] + (1,), x.dtype)
        xm1 = jnp.concatenate([zero, x[..., :-1]], axis=-1)
        xp1 = jnp.concatenate([x[..., 1:], zero], axis=-1)
        y = (jnp.einsum('oc,ncl->nol', w[0], xm1)
             + jnp.einsum('oc,ncl->nol', w[1], x)
             + jnp.einsum('oc,ncl->nol', w[2], xp1))
        y = y + b[None]
        y = y * s[None] + t[None]
        return jnp.maximum(y, 0.0)

    h = cbr(x, params["w1"], params["b1"], params["s1"], params["t1"])
    return cbr(h, params["w2"], params["b2"], params["s2"], params["t2"])


# ---------------------------------------------------------------------------
# Main
# ---------------------------------------------------------------------------
if __name__ == "__main__":
    N, C1, L1 = 2, 4, 8          # x1 from deeper stage
    C2, L2 = 4, 18               # x2 skip connection; diff = 18 - 16 = 2
    C_in = C1 + C2               # DoubleConv(in_channels=8, out_channels=4)
    C_out = 4
    eps = 1e-5

    keys = jax.random.split(jax.random.PRNGKey(0), 14)
    x1 = jax.random.normal(keys[0], (N, C1, L1), jnp.float32)
    x2 = jax.random.normal(keys[1], (N, C2, L2), jnp.float32)

    def make_layer(k6, cin, cout):
        kw, kb, kg, kbe, km, kv = k6
        w = 0.2 * jax.random.normal(kw, (3, cout, cin), jnp.float32)  # (k, Cout, Cin)
        b = 0.1 * jax.random.normal(kb, (cout, 1), jnp.float32)
        gamma = 1.0 + 0.1 * jax.random.normal(kg, (cout, 1), jnp.float32)
        beta = 0.1 * jax.random.normal(kbe, (cout, 1), jnp.float32)
        rmean = 0.1 * jax.random.normal(km, (cout, 1), jnp.float32)
        rvar = 1.0 + jax.random.uniform(kv, (cout, 1), jnp.float32)
        s = gamma / jnp.sqrt(rvar + eps)      # BatchNorm eval-mode scale
        t = beta - rmean * s                  # BatchNorm eval-mode shift
        return w, b, s, t

    w1, b1, s1, t1 = make_layer(keys[2:8], C_in, C_out)
    w2, b2, s2, t2 = make_layer(keys[8:14], C_out, C_out)
    params = dict(w1=w1, b1=b1, s1=s1, t1=t1, w2=w2, b2=b2, s2=s2, t2=t2)

    out = up_forward(x1, x2, params)
    out = jax.block_until_ready(out)

    ref = jax.block_until_ready(up_reference(x1, x2, params))
    # bf16 MXU operands (f32 accumulate) -> slightly loosened tolerance.
    if not np.allclose(np.asarray(out), np.asarray(ref), rtol=2e-2, atol=2e-2):
        raise AssertionError("Pallas kernel does not match JAX reference")

    print("KERNEL_OK")
</pallas_src>

<mosaic_0001>
module attributes {stable_mosaic.version = 11 : i64} {
  func.func @kernel(%arg0: i32, %arg1: memref<1x16x128xf32, #tpu.memory_space<vmem>>, %arg2: memref<1x16x128xf32, #tpu.memory_space<vmem>>, %arg3: memref<128x128xbf16, #tpu.memory_space<vmem>>, %arg4: memref<16x96xbf16, #tpu.memory_space<vmem>>, %arg5: memref<16x128xf32, #tpu.memory_space<vmem>>, %arg6: memref<16x48xbf16, #tpu.memory_space<vmem>>, %arg7: memref<16x128xf32, #tpu.memory_space<vmem>>, %arg8: memref<1x16x128xf32, #tpu.memory_space<vmem>>) attributes {dimension_semantics = [#tpu.dimension_semantics<parallel>], iteration_bounds = array<i64: 2>, scalar_prefetch = 0 : i64, scratch_operands = 0 : i64, tpu.core_type = #tpu.core_type<tc>, window_params = [{transform_indices = @transform_0, window_bounds = array<i64: 1, 16, 128>}, {transform_indices = @transform_1, window_bounds = array<i64: 1, 16, 128>}, {pipeline_mode = #tpu.pipeline_mode<synchronous>, transform_indices = @transform_2, window_bounds = array<i64: 128, 128>}, {pipeline_mode = #tpu.pipeline_mode<synchronous>, transform_indices = @transform_3, window_bounds = array<i64: 16, 96>}, {pipeline_mode = #tpu.pipeline_mode<synchronous>, transform_indices = @transform_4, window_bounds = array<i64: 16, 128>}, {pipeline_mode = #tpu.pipeline_mode<synchronous>, transform_indices = @transform_5, window_bounds = array<i64: 16, 48>}, {pipeline_mode = #tpu.pipeline_mode<synchronous>, transform_indices = @transform_6, window_bounds = array<i64: 16, 128>}, {transform_indices = @transform_7, window_bounds = array<i64: 1, 16, 128>}]} {
    %c0 = arith.constant 0 : index
    %c0_0 = arith.constant 0 : index
    %c0_1 = arith.constant 0 : index
    %0 = vector.load %arg1[%c0, %c0_0, %c0_1] : memref<1x16x128xf32, #tpu.memory_space<vmem>>, vector<1x16x128xf32>
    %1 = vector.shape_cast %0 : vector<1x16x128xf32> to vector<16x128xf32>
    %2 = arith.truncf %1 : vector<16x128xf32> to vector<16x128xbf16>
    %c0_2 = arith.constant 0 : index
    %c0_3 = arith.constant 0 : index
    %3 = vector.load %arg3[%c0_2, %c0_3] : memref<128x128xbf16, #tpu.memory_space<vmem>>, vector<128x128xbf16>
    %cst = arith.constant dense<0.000000e+00> : vector<16x128xf32>
    %4 = tpu.matmul %2, %3, %cst {dimension_numbers = #tpu.dot_dimension_numbers<[1], [0], [0], [1], [0, 0, 1, 1], [], []>} : vector<16x128xbf16>, vector<128x128xbf16>, vector<16x128xf32> -> vector<16x128xf32>
    %c0_4 = arith.constant 0 : index
    %c0_5 = arith.constant 0 : index
    %c0_6 = arith.constant 0 : index
    %5 = vector.load %arg2[%c0_4, %c0_5, %c0_6] : memref<1x16x128xf32, #tpu.memory_space<vmem>>, vector<1x16x128xf32>
    %6 = vector.shape_cast %5 : vector<1x16x128xf32> to vector<16x128xf32>
    %c1_i32 = arith.constant 1 : i32
    %7 = tpu.dynamic_rotate %6 by %c1_i32 dim 1 : vector<16x128xf32>, i32 -> vector<16x128xf32>
    %c127_i32 = arith.constant 127 : i32
    %8 = tpu.dynamic_rotate %6 by %c127_i32 dim 1 : vector<16x128xf32>, i32 -> vector<16x128xf32>
    %9 = tpu.concatenate %7, %6, %8 in 0 : vector<16x128xf32>, vector<16x128xf32>, vector<16x128xf32> -> vector<48x128xf32>
    %c1_i32_7 = arith.constant 1 : i32
    %10 = tpu.dynamic_rotate %4 by %c1_i32_7 dim 1 : vector<16x128xf32>, i32 -> vector<16x128xf32>
    %c127_i32_8 = arith.constant 127 : i32
    %11 = tpu.dynamic_rotate %4 by %c127_i32_8 dim 1 : vector<16x128xf32>, i32 -> vector<16x128xf32>
    %12 = tpu.concatenate %10, %4, %11 in 0 : vector<16x128xf32>, vector<16x128xf32>, vector<16x128xf32> -> vector<48x128xf32>
    %13 = tpu.concatenate %9, %12 in 0 : vector<48x128xf32>, vector<48x128xf32> -> vector<96x128xf32>
    %c0_9 = arith.constant 0 : index
    %c0_10 = arith.constant 0 : index
    %14 = vector.load %arg4[%c0_9, %c0_10] : memref<16x96xbf16, #tpu.memory_space<vmem>>, vector<16x96xbf16>
    %15 = arith.truncf %13 : vector<96x128xf32> to vector<96x128xbf16>
    %cst_11 = arith.constant dense<0.000000e+00> : vector<16x128xf32>
    %16 = tpu.matmul %14, %15, %cst_11 {dimension_numbers = #tpu.dot_dimension_numbers<[1], [0], [0], [1], [0, 0, 1, 1], [], []>} : vector<16x96xbf16>, vector<96x128xbf16>, vector<16x128xf32> -> vector<16x128xf32>
    %c0_12 = arith.constant 0 : index
    %c0_13 = arith.constant 0 : index
    %17 = vector.load %arg5[%c0_12, %c0_13] : memref<16x128xf32, #tpu.memory_space<vmem>>, vector<16x128xf32>
    %18 = arith.addf %16, %17 : vector<16x128xf32>
    %cst_14 = arith.constant 0.000000e+00 : f32
    %19 = vector.broadcast %cst_14 : f32 to vector<16x128xf32>
    %20 = arith.maximumf %18, %19 : vector<16x128xf32>
    %c0_15 = arith.constant 0 : index
    %c0_16 = arith.constant 0 : index
    %21 = vector.load %arg6[%c0_15, %c0_16] : memref<16x48xbf16, #tpu.memory_space<vmem>>, vector<16x48xbf16>
    %c1_i32_17 = arith.constant 1 : i32
    %22 = tpu.dynamic_rotate %20 by %c1_i32_17 dim 1 : vector<16x128xf32>, i32 -> vector<16x128xf32>
    %c127_i32_18 = arith.constant 127 : i32
    %23 = tpu.dynamic_rotate %20 by %c127_i32_18 dim 1 : vector<16x128xf32>, i32 -> vector<16x128xf32>
    %24 = tpu.concatenate %22, %20, %23 in 0 : vector<16x128xf32>, vector<16x128xf32>, vector<16x128xf32> -> vector<48x128xf32>
    %25 = arith.truncf %24 : vector<48x128xf32> to vector<48x128xbf16>
    %cst_19 = arith.constant dense<0.000000e+00> : vector<16x128xf32>
    %26 = tpu.matmul %21, %25, %cst_19 {dimension_numbers = #tpu.dot_dimension_numbers<[1], [0], [0], [1], [0, 0, 1, 1], [], []>} : vector<16x48xbf16>, vector<48x128xbf16>, vector<16x128xf32> -> vector<16x128xf32>
    %c0_20 = arith.constant 0 : index
    %c0_21 = arith.constant 0 : index
    %27 = vector.load %arg7[%c0_20, %c0_21] : memref<16x128xf32, #tpu.memory_space<vmem>>, vector<16x128xf32>
    %28 = arith.addf %26, %27 : vector<16x128xf32>
    %cst_22 = arith.constant 0.000000e+00 : f32
    %29 = vector.broadcast %cst_22 : f32 to vector<16x128xf32>
    %30 = arith.maximumf %28, %29 : vector<16x128xf32>
    %c0_23 = arith.constant 0 : index
    %c0_24 = arith.constant 0 : index
    %c0_25 = arith.constant 0 : index
    %31 = vector.load %arg8[%c0_23, %c0_24, %c0_25] : memref<1x16x128xf32, #tpu.memory_space<vmem>>, vector<1x16x128xf32>
    %32 = vector.shape_cast %31 : vector<1x16x128xf32> to vector<16x128xf32>
    %33 = vector.shape_cast %30 : vector<16x128xf32> to vector<1x16x128xf32>
    tpu.vector_store %arg8[%c0_23, %c0_24, %c0_25], %33 {strides = array<i32>} : memref<1x16x128xf32, #tpu.memory_space<vmem>>, vector<1x16x128xf32>,
    return
  }
  func.func @transform_0(%arg0: i32) -> (i32, i32, i32) {
    %c0_i32 = arith.constant 0 : i32
    %c0_i32_0 = arith.constant 0 : i32
    %c0_i32_1 = arith.constant 0 : i32
    return %arg0, %c0_i32, %c0_i32_0 : i32, i32, i32
  }
  func.func @transform_1(%arg0: i32) -> (i32, i32, i32) {
    %c0_i32 = arith.constant 0 : i32
    %c0_i32_0 = arith.constant 0 : i32
    %c0_i32_1 = arith.constant 0 : i32
    return %arg0, %c0_i32, %c0_i32_0 : i32, i32, i32
  }
  func.func @transform_2(%arg0: i32) -> (i32, i32) {
    %c0_i32 = arith.constant 0 : i32
    %c0_i32_0 = arith.constant 0 : i32
    %c0_i32_1 = arith.constant 0 : i32
    return %c0_i32, %c0_i32_0 : i32, i32
  }
  func.func @transform_3(%arg0: i32) -> (i32, i32) {
    %c0_i32 = arith.constant 0 : i32
    %c0_i32_0 = arith.constant 0 : i32
    %c0_i32_1 = arith.constant 0 : i32
    return %c0_i32, %c0_i32_0 : i32, i32
  }
  func.func @transform_4(%arg0: i32) -> (i32, i32) {
    %c0_i32 = arith.constant 0 : i32
    %c0_i32_0 = arith.constant 0 : i32
    %c0_i32_1 = arith.constant 0 : i32
    return %c0_i32, %c0_i32_0 : i32, i32
  }
  func.func @transform_5(%arg0: i32) -> (i32, i32) {
    %c0_i32 = arith.constant 0 : i32
    %c0_i32_0 = arith.constant 0 : i32
    %c0_i32_1 = arith.constant 0 : i32
    return %c0_i32, %c0_i32_0 : i32, i32
  }
  func.func @transform_6(%arg0: i32) -> (i32, i32) {
    %c0_i32 = arith.constant 0 : i32
    %c0_i32_0 = arith.constant 0 : i32
    %c0_i32_1 = arith.constant 0 : i32
    return %c0_i32, %c0_i32_0 : i32, i32
  }
  func.func @transform_7(%arg0: i32) -> (i32, i32, i32) {
    %c0_i32 = arith.constant 0 : i32
    %c0_i32_0 = arith.constant 0 : i32
    %c0_i32_1 = arith.constant 0 : i32
    return %arg0, %c0_i32, %c0_i32_0 : i32, i32, i32
  }
}

</mosaic_0001>

<bundles_post_ra>
// kernel: tpu_custom_call.1
= control target key start
LH: loop header
LB: loop body
LE: loop exit
PB: predicated region body
PF: predicated region fallthrough
CT: control target
= control target key end

     0   :  { %s1748_s0 = inlined_call_operand.hbm [shape: f32[2,16,128], index: 0, kind: input, shape index: {}]   ;;  %s1749_s1 = inlined_call_operand.hbm [shape: f32[2,16,128], index: 1, kind: input, shape index: {}]   ;;  %s1750_s2 = inlined_call_operand.hbm [shape: bf16[128,128], index: 2, kind: input, shape index: {}]   ;;  %s1751_s3 = inlined_call_operand.hbm [shape: bf16[16,96], index: 3, kind: input, shape index: {}]   ;;  %s1752_s4 = inlined_call_operand.hbm [shape: f32[16,128], index: 4, kind: input, shape index: {}]   ;;  %s1753_s5 = inlined_call_operand.hbm [shape: bf16[16,48], index: 5, kind: input, shape index: {}]   ;;  %s1754_s6 = inlined_call_operand.vmem [shape: f32[16,128], index: 6, kind: input, shape index: {}]   ;;  %s1755_s7 = inlined_call_operand.hbm [shape: f32[2,16,128], index: 7, kind: output, shape index: {}]  }
   0x1   :  { %1766 = sst [smem:[#allocation21_spill]] %s1748_s0 }
   0x2   :  { %1767 = sst [smem:[#allocation22_spill]] %s1750_s2 }
   0x3   :  { %1768 = sst [smem:[#allocation23_spill]] %s1751_s3 }
   0x4   :  { %12 = vsyncpa [#allocation3], 0 }
   0x5   :  { %14 = vsyncpa [#allocation3 + $0x1], 0 }
   0x6   :  { %15 = vsyncpa [#allocation6], 0 }
   0x7   :  { %17 = vsyncpa [#allocation6 + $0x1], 0 }
   0x8   :  { %18 = vsyncpa [#allocation9], 0 }
   0x9   :  { %19 = vsyncpa [#allocation12], 0 }
   0xa   :  { %20 = vsyncpa [#allocation4], 0 }
   0xb   :  { %22 = vsyncpa [#allocation4 + $0x1], 0  ;;  %s1363_s24 = smov 0   ;;  %s1365_s25 = smov 0  }
   0xc   :  { %s1367_s26 = smov 0   ;;  %s1369_s27 = smov 0  }
   0xd LB: > { %s1384_s28 = sadd.s32 4294967295, %s1304_s27   ;;  %s801_s29 = sadd.s32 4294967294, %s1304_s27   ;;  %s1304_s27 = sphi %s1369_s27, %s1799_s27   ;;  %s1300_s26 = sphi %s1367_s26, %s1798_s26   ;;  %s1296_s25 = sphi %s1365_s25, %s1797_s25   ;;  %s1292_s24 = sphi %s1363_s24, %s1796_s24  }
   0xe   : > { %p48_p0 = scmp.ne.s32.totalorder %s1296_s25, %s1292_s24  ;;  %p1756_p1 = scmp.eq.s32.totalorder %s1384_s28, 0 }
   0xf   : > { %p209_p3 = scmp.eq.s32.totalorder %s801_s29, 1  ;;  %p802_p5 = scmp.ge.s32.totalorder %s1304_s27, 1 }
  0x10   : > { %p1393_p4 = por %p1756_p1, %p48_p0  ;;  %p216_p7 = scmp.lt.s32.totalorder %s1304_s27, 3 }
  0x11   : > { %p1398_p6 = por %p209_p3, %p48_p0  ;;  %s1306_s10 = smov [#allocation7]  }
  0x12   : > { %s1769_s30 = scalar_select %p1393_p4, 1, 0 }
  0x13   : > { %s1770_s8 = scalar_select %p1398_p6, 1, 0 }
  0x14   : > { %p1403_p8 = pnand %p802_p5, %p216_p7  ;;  %s228_s11 = sshll.u32 %s1306_s10, 4  ;;  %s1407_s11 = int_to_ptr.vmem [resolvable:$true] %s228_s11 }
  0x15   : > { %1771 = sst [smem:[#allocation20_spill]] %s1770_s8  ;;  %s1307_s13 = smov [#allocation8]  }
  0x16   : > { %s1772_s9 = scalar_select %p1403_p8, 1, 0 }
  0x17   : > { %p930_p9 = pneg %p1403_p8  ;;  %s241_s14 = sshll.u32 %s1307_s13, 4  ;;  %s1418_s14 = int_to_ptr.vmem [resolvable:$true] %s241_s14 }
  0x18   : > { %s1308_s15 = smov [#allocation10]   ;;  %s1774_s2 = sld [smem:[#allocation22_spill]] }
  0x19   : > { %p1414_p11 = pnand %p930_p9, %p1756_p1  ;;  %s1420_s16 = sshll.u32 %s1308_s15, 4  ;;  %s255_s16 = int_to_ptr.vmem [resolvable:$true] %s1420_s16 }
  0x1b   : > { %p1430_p13 = pneg %p1414_p11 }
  0x1e   : > { %s1050_s19 = scalar_lea.hbm %s1774_s2, 1024 }
  0x1f   : > { %p1051_p12 = scmp.ne.s32.totalorder %s1774_s2, %s1050_s19  ;;  %p1057_p5 = scmp.lt.u32.totalorder %s1050_s19, %s1774_s2 }
  0x21   : > { %p1053_p0 = pnand %p1430_p13, %p1051_p12 }
  0x23   : > { %p1054_p3 = pneg %p1053_p0 }
  0x25   : > { %p1059_p7 = pnand %p1057_p5, %p1054_p3 }
  0x27   : > { %1062 = shalt.err (!%p1059_p7)
}
  0x28   : > { %s1063_s10 = scalar_lea.vmem %s1407_s11, 1024  ;;  %p1071_p2 = scmp.lt.s32.totalorder %s1407_s11, %s1407_s11 }
  0x29   : > { %p1064_p9 = scmp.ne.s32.totalorder %s1407_s11, %s1063_s10  ;;  %p1072_p6 = scmp.lt.s32.totalorder %s1063_s10, %s1063_s10 }
  0x2b   : > { %p1066_p10 = pnand %p1064_p9, %p1430_p13  ;;  %p1073_p12 = por %p1072_p6, %p1071_p2 }
  0x2d   : > { %p1067_p1 = pneg %p1066_p10 }
  0x2f   : > { %p1074_p0 = pnand %p1073_p12, %p1067_p1 }
  0x31   : > { %1077 = shalt.err (!%p1074_p0)
}
  0x32   : > { %s1760_s13 = smov 64   ;;  %s1761_s15 = smov 4  }
  0x33   : > { %933 = dma.hbm_to_vmem [thread:$0]  (!%p1414_p11), %s1774_s2, 1024, %s1407_s11, [#allocation6], %s1760_s13, %s1760_s13, %s1761_s15  }
  0x34   : > { %s1776_s3 = sld [smem:[#allocation23_spill]] }
  0x3a   : > { %s1078_s21 = scalar_lea.hbm %s1776_s3, 128 }
  0x3b   : > { %p1079_p1 = scmp.ne.s32.totalorder %s1776_s3, %s1078_s21  ;;  %p1085_p10 = scmp.lt.u32.totalorder %s1078_s21, %s1776_s3 }
  0x3d   : > { %p1081_p2 = pnand %p1079_p1, %p1430_p13 }
  0x3f   : > { %p1082_p6 = pneg %p1081_p2 }
  0x41   : > { %p1087_p3 = pnand %p1085_p10, %p1082_p6 }
  0x43   : > { %1090 = shalt.err (!%p1087_p3)
}
  0x44   : > { %s1091_s11 = scalar_lea.vmem %s1418_s14, 128  ;;  %p1099_p12 = scmp.lt.s32.totalorder %s1418_s14, %s1418_s14 }
  0x45   : > { %p1092_p5 = scmp.ne.s32.totalorder %s1418_s14, %s1091_s11  ;;  %p1100_p0 = scmp.lt.s32.totalorder %s1091_s11, %s1091_s11 }
  0x47   : > { %p1094_p7 = pnand %p1092_p5, %p1430_p13  ;;  %p1101_p1 = por %p1100_p0, %p1099_p12 }
  0x49   : > { %p1095_p9 = pneg %p1094_p7 }
  0x4b   : > { %p1102_p2 = pnand %p1101_p1, %p1095_p9 }
  0x4d   : > { %1105 = shalt.err (!%p1102_p2)
}
  0x4e   : > { %936 = dma.hbm_to_vmem [thread:$0]  (!%p1414_p11), %s1776_s3, 128, %s1418_s14, [#allocation9], %s1760_s13, %s1760_s13, %s1761_s15  }
  0x4f   : > { %s1106_s20 = scalar_lea.hbm %s1752_s4, 256 }
  0x50   : > { %p1107_p6 = scmp.ne.s32.totalorder %s1752_s4, %s1106_s20  ;;  %p1113_p5 = scmp.lt.u32.totalorder %s1106_s20, %s1752_s4 }
  0x52   : > { %p1109_p10 = pnand %p1107_p6, %p1430_p13 }
  0x54   : > { %p1110_p3 = pneg %p1109_p10 }
  0x56   : > { %p1115_p7 = pnand %p1113_p5, %p1110_p3 }
  0x58   : > { %1118 = shalt.err (!%p1115_p7)
}
  0x59   : > { %s1119_s11 = scalar_lea.vmem %s255_s16, 256  ;;  %p1127_p1 = scmp.lt.s32.totalorder %s255_s16, %s255_s16 }
  0x5a   : > { %p1120_p9 = scmp.ne.s32.totalorder %s255_s16, %s1119_s11  ;;  %p1128_p2 = scmp.lt.s32.totalorder %s1119_s11, %s1119_s11 }
  0x5c   : > { %p1122_p12 = pnand %p1120_p9, %p1430_p13  ;;  %p1129_p4 = por %p1128_p2, %p1127_p1 }
  0x5e   : > { %p1123_p0 = pneg %p1122_p12 }
  0x60   : > { %p1130_p8 = pnand %p1129_p4, %p1123_p0 }
  0x62   : > { %1133 = shalt.err (!%p1130_p8)
}
  0x63   : > { %s1762_s14 = smov 128   ;;  %s1764_s8 = smov 8  }
  0x64   : > { %939 = dma.hbm_to_vmem [thread:$0]  (!%p1414_p11), %s1752_s4, 256, %s255_s16, [#allocation9], %s1762_s14, %s1762_s14, %s1764_s8  }
  0x65   : > { %s1313_s19 = smov [#allocation11]   ;;  %s1134_s29 = scalar_lea.hbm %s1753_s5, 128 }
  0x66   : > { %s267_s20 = sshll.u32 %s1313_s19, 4  ;;  %p1135_p4 = scmp.ne.s32.totalorder %s1753_s5, %s1134_s29  ;;  %s268_s20 = int_to_ptr.vmem [resolvable:$true] %s267_s20 }
  0x67   : > { %p1141_p10 = scmp.lt.u32.totalorder %s1134_s29, %s1753_s5 }
  0x68   : > { %p1137_p8 = pnand %p1135_p4, %p1430_p13 }
  0x6a   : > { %p1138_p6 = pneg %p1137_p8 }
  0x6c   : > { %p1143_p3 = pnand %p1141_p10, %p1138_p6 }
  0x6e   : > { %1146 = shalt.err (!%p1143_p3)
}
  0x6f   : > { %s1147_s16 = scalar_lea.vmem %s268_s20, 128  ;;  %p1155_p12 = scmp.lt.s32.totalorder %s268_s20, %s268_s20 }
  0x70   : > { %p1148_p5 = scmp.ne.s32.totalorder %s268_s20, %s1147_s16  ;;  %p1156_p0 = scmp.lt.s32.totalorder %s1147_s16, %s1147_s16 }
  0x72   : > { %p1150_p7 = pnand %p1148_p5, %p1430_p13  ;;  %p1157_p1 = por %p1156_p0, %p1155_p12 }
  0x74   : > { %p1151_p9 = pneg %p1150_p7 }
  0x76   : > { %p1158_p2 = pnand %p1157_p1, %p1151_p9 }
  0x78   : > { %1161 = shalt.err (!%p1158_p2)
}
  0x79   : > { %s1777_s17 = smov 4   ;;  %s1778_s18 = smov 64  }
  0x7a   : > { %942 = dma.hbm_to_vmem [thread:$0]  (!%p1414_p11), %s1753_s5, 128, %s268_s20, [#allocation12], %s1778_s18, %s1778_s18, %s1777_s17  }
  0x7b   : > { %s1524_s22 = sadd.s32 1, %s1304_s27   ;;  %s35_s12 = sadd.s32 1, %s1300_s26 }
  0x7c   : > { %s32_s19 = ssub.s32 %s1304_s27, %s1524_s22  ;;  %p42_p13 = scmp.ne.s32.totalorder %s1300_s26, %s1296_s25 }
  0x7d   : > { %p33_p4 = scmp.eq.s32.totalorder %s32_s19, 0  ;;  %p43_p8 = scmp.eq.s32.totalorder %s1304_s27, 0 }
  0x7e   : > { %p1779_p6 = scmp.eq.s32.totalorder %s1384_s28, 1  ;;  %p958_p3 = scmp.lt.s32.totalorder %s1304_s27, 2 }
  0x7f   : > { %s1540_s23 = scalar_select %p33_p4, %s1300_s26, %s35_s12  }
  0x80   : > { %p1534_p10 = por %p1779_p6, %p42_p13  ;;  %p44_p5 = por %p43_p8, %p42_p13 }
  0x81   : > { %s284_s29 = sand.u32 1, %s1300_s26   ;;  %s839_s20 = sshll.u32 %s1304_s27, 8 }
  0x82   : > { %s808_s10 = sshll.u32 %s284_s29, 4  ;;  %s1781_s0 = sld [smem:[#allocation21_spill]] }
  0x83   : > { %s288_s18 = scalar_lea.vmem [#allocation2], %s808_s10  ;;  %p1551_p11 = pnand %p958_p3, %p44_p5 }
  0x84   : > { %s295_s13 = sshll.u32 %s288_s18, 4  ;;  %s1558_s11 = scalar_lea.hbm %s1749_s1, %s839_s20  ;;  %s1549_s13 = int_to_ptr.vmem [resolvable:$true] %s295_s13 }
  0x85   : > { %s309_s16 = scalar_lea.vmem [#allocation5], %s808_s10  ;;  %s1562_s8 = scalar_lea.sflag [#allocation3], %s284_s29 }
  0x86   : > { %s1560_s14 = sshll.u32 %s309_s16, 4  ;;  %p1164_p9 = pneg %p1551_p11  ;;  %s1594_s14 = int_to_ptr.vmem [resolvable:$true] %s1560_s14 }
  0x88   : > { %s1547_s17 = scalar_lea.hbm %s1781_s0, %s839_s20  ;;  %s1167_s12 = scalar_lea.hbm %s1781_s0, 512 }
  0x89   : > { %s1162_s18 = scalar_lea.hbm %s1547_s17, 256  ;;  %p1168_p1 = scmp.lt.u32.totalorder %s1547_s17, %s1781_s0 }
  0x8a   : > { %p1163_p7 = scmp.ne.s32.totalorder %s1547_s17, %s1162_s18  ;;  %p1169_p2 = scmp.lt.u32.totalorder %s1167_s12, %s1162_s18 }
  0x8b   : > { %p1171_p4 = scmp.lt.u32.totalorder %s1162_s18, %s1547_s17 }
  0x8c   : > { %p1165_p12 = pnand %p1164_p9, %p1163_p7  ;;  %p1170_p13 = por %p1169_p2, %p1168_p1 }
  0x8e   : > { %p1166_p0 = pneg %p1165_p12  ;;  %p1172_p8 = por %p1171_p4, %p1170_p13 }
  0x90   : > { %p1173_p6 = pnand %p1172_p8, %p1166_p0 }
  0x92   : > { %1176 = shalt.err (!%p1173_p6)
}
  0x93   : > { %s1177_s29 = scalar_lea.vmem %s1549_s13, 256  ;;  %s1314_s2 = smov [#allocation2]  }
  0x94   : > { %p1178_p3 = scmp.ne.s32.totalorder %s1549_s13, %s1177_s29  ;;  %s1182_s3 = sshll.u32 %s1314_s2, 4  ;;  %s1183_s3 = int_to_ptr.vmem [resolvable:$false] %s1182_s3 }
  0x95   : > { %s1184_s10 = scalar_lea.vmem %s1183_s3, 512  ;;  %p1185_p12 = scmp.lt.s32.totalorder %s1549_s13, %s1183_s3 }
  0x96   : > { %p1180_p5 = pnand %p1178_p3, %p1164_p9  ;;  %p1186_p1 = scmp.lt.s32.totalorder %s1184_s10, %s1177_s29 }
  0x98   : > { %p1181_p7 = pneg %p1180_p5  ;;  %p1187_p2 = por %p1186_p1, %p1185_p12 }
  0x9a   : > { %p1188_p13 = pnand %p1187_p2, %p1181_p7 }
  0x9c   : > { %1191 = shalt.err (!%p1188_p13)
}
  0x9d   : > { %s1783_s16 = smov 8   ;;  %s1784_s18 = smov 128  }
  0x9e   : > { %946 = dma.hbm_to_vmem [thread:$0]  (!%p1551_p11), %s1547_s17, 256, %s1549_s13, %s1562_s8, %s1784_s18, %s1784_s18, %s1783_s16  }
  0x9f   : > { %s305_s12 = sand.u32 1, %s1304_s27   ;;  %s1192_s20 = scalar_lea.hbm %s1558_s11, 256 }
  0xa0   : > { %s1597_s19 = scalar_lea.sflag [#allocation6], %s305_s12  ;;  %p1193_p0 = scmp.ne.s32.totalorder %s1558_s11, %s1192_s20 }
  0xa1   : > { %s1197_s3 = scalar_lea.hbm %s1749_s1, 512  ;;  %p1198_p6 = scmp.lt.u32.totalorder %s1558_s11, %s1749_s1 }
  0xa2   : > { %p1195_p4 = pnand %p1193_p0, %p1164_p9  ;;  %p1199_p3 = scmp.lt.u32.totalorder %s1197_s3, %s1192_s20 }
  0xa3   : > { %p1201_p7 = scmp.lt.u32.totalorder %s1192_s20, %s1558_s11 }
  0xa4   : > { %p1196_p8 = pneg %p1195_p4  ;;  %p1200_p5 = por %p1199_p3, %p1198_p6 }
  0xa6   : > { %p1202_p12 = por %p1201_p7, %p1200_p5 }
  0xa8   : > { %p1203_p1 = pnand %p1202_p12, %p1196_p8 }
  0xaa   : > { %1206 = shalt.err (!%p1203_p1)
}
  0xab   : > { %s1207_s8 = scalar_lea.vmem %s1594_s14, 256  ;;  %s1315_s17 = smov [#allocation5]  }
  0xac   : > { %p1208_p2 = scmp.ne.s32.totalorder %s1594_s14, %s1207_s8  ;;  %s1212_s13 = sshll.u32 %s1315_s17, 4  ;;  %s1213_s13 = int_to_ptr.vmem [resolvable:$false] %s1212_s13 }
  0xad   : > { %s1214_s0 = scalar_lea.vmem %s1213_s13, 512  ;;  %p1215_p4 = scmp.lt.s32.totalorder %s1594_s14, %s1213_s13 }
  0xae   : > { %p1210_p13 = pnand %p1208_p2, %p1164_p9  ;;  %p1216_p6 = scmp.lt.s32.totalorder %s1214_s0, %s1207_s8 }
  0xb0   : > { %p1211_p0 = pneg %p1210_p13  ;;  %p1217_p3 = por %p1216_p6, %p1215_p4 }
  0xb2   : > { %p1218_p5 = pnand %p1217_p3, %p1211_p0 }
  0xb4   : > { %1221 = shalt.err (!%p1218_p5)
}
  0xb5   : > { %949 = dma.hbm_to_vmem [thread:$0]  (!%p1551_p11), %s1558_s11, 256, %s1594_s14, %s1597_s19, %s1784_s18, %s1784_s18, %s1783_s16  }
  0xb6   : > { %p1785_p9 = scmp.ne.s32.totalorder %s1772_s9, 0 }
  0xb7   : > { %s1629_s12 = sand.u32 (!%p1785_p9), 1, %s1296_s25   ;;  %p1786_p8 = scmp.ne.s32.totalorder (!%p1785_p9), %s1769_s30, 0 }
  0xb8   : > { %328 = sbr.rel (%p1785_p9) target bundleno = 1168 (0x490), region = 48  ;;  %s1632_s20 = sshll.u32 (!%p1785_p9), %s1629_s12, 4 }
  0xb9   : > { %s331_s15 = scalar_lea.sflag (!%p1785_p9), [#allocation3], %s1629_s12  ;;  %s334_s29 = scalar_lea.vmem (!%p1785_p9), [#allocation2], %s1632_s20 }
  0xbf   : > { %1267 = dma.done.wait (%p1786_p8), %s331_s15, 256  }
  0xc0   : > { %1269 = vsyncadd (%p1786_p8), %s331_s15, 4294967040  ;;  %s339_s9 = sand.u32 1, %s1384_s28   ;;  %s343_s11 = scalar_lea.vmem [#allocation5], %s1632_s20 }
  0xc1   : > { %s340_s14 = scalar_lea.sflag [#allocation6], %s339_s9 }
  0xc2   : > { %1271 = dma.done.wait (%p1786_p8), %s340_s14, 256  }
  0xc3   : > { %1273 = vsyncadd (%p1786_p8), %s340_s14, 4294967040  ;;  %p1787_p11 = scmp.eq.s32.totalorder %s1384_s28, 0 }
  0xc5   : > { %1275 = dma.done.wait (%p1787_p11), [#allocation6], 1024   ;;  %p1788_p7 = pmov %p1787_p11 }
  0xc7   : > { %1277 = vsyncadd (%p1788_p7), [#allocation6], 4294966272  ;;  %p1789_p12 = pmov %p1788_p7 }
  0xc8   : > { %p1790_p1 = pmov %p1788_p7 }
  0xc9   : > { %1279 = dma.done.wait (%p1789_p12), [#allocation9], 384  }
  0xca   : > { %1281 = vsyncadd (%p1790_p1), [#allocation9], 4294966912  ;;  %p1791_p2 = pmov %p1790_p1 }
  0xcb   : > { %p1792_p13 = pmov %p1790_p1 }
  0xcc   : > { %1283 = dma.done.wait (%p1791_p2), [#allocation12], 128  }
  0xcd   : > { %1285 = vsyncadd (%p1792_p13), [#allocation12], 4294967168  ;;  %v1316_v0 = vmov 0.0   ;;  %vm1317_vm0 = vmmov 0   ;;  %v1040_v1 = vld [vmem:[#allocation7] sm:$0xff]   ;;  %v1041_v2 = vld [vmem:[#allocation7 + $0x8] sm:$0xff]  }
  0xce   : > { %862 = vmatprep.subr.bf16.mxu0 %v1316_v0  ;;  %878 = vmatprep.mubr.msk.bf16.mxu0 %vm1317_vm0, %v1316_v0  ;;  %v1042_v3 = vld [vmem:[#allocation7 + $0x10] sm:$0xff]   ;;  %v505_v5 = vld [vmem:[%s343_s11 + $0x8] sm:$0xff]  ;;  %s1318_s30 = smov 1   ;;  %v1044_v8 = vld [vmem:[#allocation7 + $0x20] sm:$0xff]   ;;  %s1319_s16 = smov 127   ;;  %vm537_vm1 = vcmask 785408  }
  0xcf   : > { %882 = vmatprep.subr.bf16.mxu1 %v1316_v0  ;;  %894 = vmatprep.mubr.msk.bf16.mxu1 %vm1317_vm0, %v1316_v0  ;;  %v504_v4 = vld [vmem:[%s343_s11] sm:$0xff]  ;;  %v1043_v6 = vld [vmem:[#allocation7 + $0x18] sm:$0xff]   ;;  %v1045_v9 = vld [vmem:[#allocation7 + $0x28] sm:$0xff]   ;;  %vm604_vm2 = vcmask 392192   ;;  %s394_s2 = scalar_lea.vmem [#allocation13], %s1632_s20  ;;  %s841_s17 = sshll.u32 %s1384_s28, 8 }
  0xd0   : > { %863 = vmatpush3.bf16.msra.mxu0 %v1040_v1  ;;  %v1010_v7 = vpack.i.bf16 %v505_v5, %v504_v4  ;;  %v1046_v10 = vld [vmem:[#allocation7 + $0x30] sm:$0xff]   ;;  %v1047_v11 = vld [vmem:[#allocation7 + $0x38] sm:$0xff]   ;;  %v525_v19 = vpack.c.bf16 %v505_v5, %v504_v4  ;;  %v1048_v38 = vld [vmem:[#allocation8] sm:$0xff]   ;;  %s667_s3 = sshll.u32 %s394_s2, 4  ;;  %s1704_s20 = scalar_lea.hbm %s1755_s7, %s841_s17  ;;  %s1699_s3 = int_to_ptr.vmem [resolvable:$true] %s667_s3 }
  0xd1   : > { %864 = vmatprep.subr.bf16.mxu0 %v1316_v0  ;;  %v396_v12 = vld [vmem:[%s334_s29] sm:$0xff]  ;;  %v397_v13 = vld [vmem:[%s334_s29 + $0x8] sm:$0xff]  ;;  %s654_s15 = scalar_lea.sflag [#allocation4], %s1629_s12  ;;  %s1222_s29 = scalar_lea.vmem %s1699_s3, 256 }
  0xd2   : > { %1011 = vrot.lane.b32.xlu0 %v1010_v7, %s1318_s30  ;;  %v398_v14 = vpack.c.bf16 %v397_v13, %v396_v12  ;;  %v530_v39 = vld [vmem:[#allocation10] sm:$0xff]  ;;  %v531_v41 = vld [vmem:[#allocation10 + $0x8] sm:$0xff]  ;;  %v1049_v59 = vld [vmem:[#allocation11] sm:$0xff]   ;;  %p1223_p0 = scmp.ne.s32.totalorder %s1699_s3, %s1222_s29  ;;  %s1320_s28 = smov [#allocation13]  }
  0xd3   : > { %v597_v60 = vld [vmem:[%s1754_s6] sm:$0xff]  ;;  %v598_v62 = vld [vmem:[%s1754_s6 + $0x8] sm:$0xff]  ;;  %s1226_s9 = sshll.u32 %s1320_s28, 4  ;;  %s1227_s9 = int_to_ptr.vmem [resolvable:$false] %s1226_s9 }
  0xd4   : > { %865 = vmatpush3.bf16.msra.mxu0 %v1041_v2  ;;  %p1224_p4 = pnand %p1223_p0, %p1534_p10  ;;  %s1228_s14 = scalar_lea.vmem %s1227_s9, 512 }
  0xd5   : > { %866 = vmatprep.subr.bf16.mxu0 %v1316_v0  ;;  %p1229_p3 = scmp.lt.s32.totalorder %s1699_s3, %s1227_s9  ;;  %p1230_p5 = scmp.lt.s32.totalorder %s1228_s14, %s1222_s29 }
  0xd6   : > { %1016 = vrot.lane.b32.xlu0 %v1010_v7, %s1319_s16  ;;  %p1225_p6 = pneg %p1224_p4 }
  0xd7   : > { %p1231_p9 = por %p1230_p5, %p1229_p3 }
  0xd8   : > { %867 = vmatpush3.bf16.msra.mxu0 %v1042_v3 }
  0xd9   : > { %868 = vmatprep.subr.bf16.mxu0 %v1316_v0  ;;  %p1232_p8 = pnand %p1231_p9, %p1225_p6 }
  0xdc   : > { %869 = vmatpush3.bf16.msra.mxu0 %v1043_v6 }
  0xdd   : > { %870 = vmatprep.subr.bf16.mxu0 %v1316_v0 }
  0xe0   : > { %871 = vmatpush3.bf16.msra.mxu0 %v1044_v8 }
  0xe1   : > { %872 = vmatprep.subr.bf16.mxu0 %v1316_v0 }
  0xe4   : > { %873 = vmatpush3.bf16.msra.mxu0 %v1045_v9 }
  0xe5   : > { %874 = vmatprep.subr.bf16.mxu0 %v1316_v0 }
  0xe8   : > { %875 = vmatpush3.bf16.msra.mxu0 %v1046_v10 }
  0xe9   : > { %876 = vmatprep.subr.bf16.mxu0 %v1316_v0 }
  0xec   : > { %877 = vmatpush3.bf16.msra.mxu0 %v1047_v11 }
  0xef   : > { %879 = vmatmul.mubr.bf16.vlgmr.msra.gmra.mrb[0].mxu0 %v398_v14 }
 0x144   : > { %v1012_v15 = vpop.permute.xlu0 %1011 }
 0x145   : > { %v1014_v16 = vunpack.i.h.bf16 %v1012_v15  ;;  %v1013_v17 = vunpack.i.l.bf16 %v1012_v15 }
 0x147   : > { %v524_v18 = vpack.c.bf16 %v1014_v16, %v1013_v17 }
 0x148   : > { %v1017_v20 = vpop.permute.xlu0 %1016 }
 0x149   : > { %883 = vmatpush3.bf16.msra.mxu1 %v524_v18  ;;  %v1019_v21 = vunpack.i.h.bf16 %v1017_v20  ;;  %v1018_v22 = vunpack.i.l.bf16 %v1017_v20 }
 0x14a   : > { %884 = vmatprep.subr.bf16.mxu1 %v1316_v0 }
 0x14b   : > { %v526_v23 = vpack.c.bf16 %v1019_v21, %v1018_v22 }
 0x14d   : > { %885 = vmatpush3.bf16.msra.mxu1 %v525_v19 }
 0x14e   : > { %886 = vmatprep.subr.bf16.mxu1 %v1316_v0 }
 0x151   : > { %887 = vmatpush3.bf16.msra.mxu1 %v526_v23 }
 0x152   : > { %888 = vmatprep.subr.bf16.mxu1 %v1316_v0 }
 0x1c2   : > { %v497_v24 = vpop.f32.mrb[0].mxu0 }
 0x1c3   : > { %v880_v25 = vpop.f32.mrb[1].mxu0 }
 0x1c4   : > { %v500_v26 = vpop.f32.mrb[2].mxu0 }
 0x1c5   : > { %v1025_v27 = vpack.i.bf16 %v500_v26, %v497_v24  ;;  %v528_v28 = vpack.c.bf16 %v500_v26, %v497_v24  ;;  %v881_v29 = vpop.f32.mrb[3].mxu0 }
 0x1c7   : > { %1021 = vrot.lane.b32.xlu1 %v1025_v27, %s1318_s30 }
 0x1cb   : > { %1026 = vrot.lane.b32.xlu1 %v1025_v27, %s1319_s16 }
 0x239   : > { %v1022_v30 = vpop.permute.xlu1 %1021 }
 0x23a   : > { %v1024_v31 = vunpack.i.h.bf16 %v1022_v30  ;;  %v1023_v32 = vunpack.i.l.bf16 %v1022_v30 }
 0x23c   : > { %v527_v33 = vpack.c.bf16 %v1024_v31, %v1023_v32 }
 0x23d   : > { %v1027_v34 = vpop.permute.xlu1 %1026 }
 0x23e   : > { %889 = vmatpush3.bf16.msra.mxu1 %v527_v33  ;;  %v1029_v35 = vunpack.i.h.bf16 %v1027_v34  ;;  %v1028_v36 = vunpack.i.l.bf16 %v1027_v34 }
 0x23f   : > { %890 = vmatprep.subr.bf16.mxu1 %v1316_v0 }
 0x240   : > { %v529_v37 = vpack.c.bf16 %v1029_v35, %v1028_v36 }
 0x242   : > { %891 = vmatpush3.bf16.msra.mxu1 %v528_v28 }
 0x243   : > { %892 = vmatprep.subr.bf16.mxu1 %v1316_v0 }
 0x246   : > { %893 = vmatpush3.bf16.msra.mxu1 %v529_v37 }
 0x247   : > { %898 = vmatprep.subr.bf16.mxu1 %v1316_v0 }
 0x249   : > { %895 = vmatmul.mubr.msk.bf16.vlgmr.msra.gmra.mrb[0].mxu1 %vm537_vm1, %v1048_v38 }
 0x24a   : > { %904 = vmatprep.mubr.msk.bf16.mxu1 %vm1317_vm0, %v1316_v0 }
 0x31c   : > { %v575_v40 = vpop.f32.mrb[0].mxu1 }
 0x31d   : > { %v576_v42 = vadd.f32 %v575_v40, %v530_v39  ;;  %v896_v43 = vpop.f32.mrb[1].mxu1 }
 0x31e   : > { %v578_v44 = vpop.f32.mrb[2].mxu1 }
 0x31f   : > { %v579_v45 = vadd.f32 %v578_v44, %v531_v41  ;;  %v897_v46 = vpop.f32.mrb[3].mxu1  ;;  %v582_v47 = vmax.f32 %v576_v42, 0.0 }
 0x321   : > { %v583_v48 = vmax.f32 %v579_v45, 0.0 }
 0x323   : > { %v595_v49 = vpack.c.bf16 %v583_v48, %v582_v47  ;;  %v1035_v50 = vpack.i.bf16 %v583_v48, %v582_v47 }
 0x325   : > { %1036 = vrot.lane.b32.xlu1 %v1035_v50, %s1319_s16  ;;  %1031 = vrot.lane.b32.xlu0 %v1035_v50, %s1318_s30 }
 0x397   : > { %v1032_v51 = vpop.permute.xlu0 %1031  ;;  %v1037_v55 = vpop.permute.xlu1 %1036 }
 0x398   : > { %v1034_v52 = vunpack.i.h.bf16 %v1032_v51  ;;  %v1033_v53 = vunpack.i.l.bf16 %v1032_v51  ;;  %v1039_v56 = vunpack.i.h.bf16 %v1037_v55  ;;  %v1038_v57 = vunpack.i.l.bf16 %v1037_v55 }
 0x39a   : > { %v594_v54 = vpack.c.bf16 %v1034_v52, %v1033_v53  ;;  %v596_v58 = vpack.c.bf16 %v1039_v56, %v1038_v57 }
 0x39c   : > { %899 = vmatpush3.bf16.msra.mxu1 %v594_v54 }
 0x39d   : > { %900 = vmatprep.subr.bf16.mxu1 %v1316_v0 }
 0x3a0   : > { %901 = vmatpush3.bf16.msra.mxu1 %v595_v49 }
 0x3a1   : > { %902 = vmatprep.subr.bf16.mxu1 %v1316_v0 }
 0x3a4   : > { %903 = vmatpush3.bf16.msra.mxu1 %v596_v58 }
 0x3a7   : > { %905 = vmatmul.mubr.msk.bf16.vlgmr.msra.gmra.mrb[4].mxu1 %vm604_vm2, %v1049_v59 }
 0x47a   : > { %v642_v61 = vpop.f32.mrb[4].mxu1 }
 0x47b   : > { %v643_v63 = vadd.f32 %v642_v61, %v597_v60  ;;  %v906_v0 = vpop.f32.mrb[5].mxu1 }
 0x47c   : > { %v645_v1 = vpop.f32.mrb[6].mxu1 }
 0x47d   : > { %v649_v2 = vmax.f32 %v643_v63, 0.0  ;;  %v646_v3 = vadd.f32 %v645_v1, %v598_v62  ;;  %v907_v4 = vpop.f32.mrb[7].mxu1 }
 0x47f   : > { %651 = vst [vmem:[%s394_s2] sm:$0xff] %v649_v2  ;;  %v650_v5 = vmax.f32 %v646_v3, 0.0 }
 0x481   : > { %652 = vst [vmem:[%s394_s2 + $0x8] sm:$0xff] %v650_v5 }
 0x482   : > { %1235 = shalt.err (!%p1232_p8)
}
 0x483   : > { %s1236_s11 = scalar_lea.hbm %s1704_s20, 256  ;;  %s1240_s18 = scalar_lea.hbm %s1755_s7, 512 }
 0x484   : > { %p1237_p11 = scmp.ne.s32.totalorder %s1704_s20, %s1236_s11  ;;  %p1241_p1 = scmp.lt.u32.totalorder %s1704_s20, %s1755_s7 }
 0x485   : > { %p1242_p2 = scmp.lt.u32.totalorder %s1240_s18, %s1236_s11  ;;  %p1244_p0 = scmp.lt.u32.totalorder %s1236_s11, %s1704_s20 }
 0x486   : > { %p1238_p7 = pnand %p1237_p11, %p1534_p10 }
 0x487   : > { %p1243_p13 = por %p1242_p2, %p1241_p1 }
 0x488   : > { %p1239_p12 = pneg %p1238_p7 }
 0x489   : > { %p1245_p4 = por %p1244_p0, %p1243_p13 }
 0x48b   : > { %p1246_p6 = pnand %p1245_p4, %p1239_p12 }
 0x48d   : > { %1249 = shalt.err (!%p1246_p6)
}
 0x48e   : > { %s1321_s10 = smov 128   ;;  %s1322_s8 = smov 8  }
 0x48f   : > { %928 = dma.vmem_to_hbm [thread:$0]  (%p1534_p10), %s1699_s3, 256, %s1704_s20, %s654_s15, %s1321_s10, %s1321_s10, %s1322_s8  }
 0x490 PF: > { %s1793_s17 = sld [smem:[#allocation20_spill]]  ;;  %s682_s13 = sand.u32 1, %s1292_s24  }
 0x491   : > { %p1795_p5 = scmp.ge.s32.totalorder %s1304_s27, 2  ;;  %s683_s0 = scalar_lea.sflag [#allocation4], %s682_s13 }
 0x496   : > { %p1794_p3 = scmp.ne.s32.totalorder %s1793_s17, 0 }
 0x498   : > { %p951_p9 = pnand %p1795_p5, %p1794_p3 }
 0x49a   : > { %1287 = dma.done.wait (!%p951_p9), %s683_s0, 256  }
 0x49b   : > { %1289 = vsyncadd (!%p951_p9), %s683_s0, 4294967040  ;;  %p25_p8 = scmp.ge.s32.totalorder %s1524_s22, 4   ;;  %s1796_s24 = smov %s1296_s25 }
 0x49c   : > { %s1797_s25 = smov %s1300_s26  ;;  %s1798_s26 = smov %s1540_s23 }
 0x49d   : > { %s1799_s27 = smov %s1524_s22  ;;  %27 = sbr.rel (!%p25_p8) target bundleno = 13 (0xd), region = 122 }
 0x4a4   :  { %688 = vsyncpa [#allocation3], 1 }
 0x4a5   :  { %690 = vsyncpa [#allocation3 + $0x1], 1 }
 0x4a6   :  { %691 = vsyncpa [#allocation6], 1 }
 0x4a7   :  { %693 = vsyncpa [#allocation6 + $0x1], 1 }
 0x4a8   :  { %694 = vsyncpa [#allocation9], 1 }
 0x4a9   :  { %695 = vsyncpa [#allocation12], 1 }
 0x4aa   :  { %696 = vsyncpa [#allocation4], 1 }
 0x4ab   :  { %698 = vsyncpa [#allocation4 + $0x1], 1 }

</bundles_post_ra>
